<compile_context>
chip_gen: v5e
topology: v5e:2x2
jax: 0.10.0
libtpu: 0.0.40
codegen_flags: <defaults>
</compile_context>

<pallas_src>
import functools

import jax
import jax.numpy as jnp
from jax.experimental import pallas as pl
from jax.experimental.pallas import tpu as pltpu


def _round_up(n, m):
    return ((n + m - 1) // m) * m


def _cdiv(a, b):
    return (a + b - 1) // b


def _pick_tile(batch, block_rows):
    """Batch tile (lane axis): multiple of 128, and prefer >=2 / even grid
    steps so megacore sharding on v7x is balanced."""
    b128 = _round_up(batch, 128)
    tb = min(_round_up(block_rows, 128), b128)
    steps = _cdiv(b128, tb)
    if b128 >= 256 and steps % 2 == 1:
        cand = _round_up(_cdiv(b128, steps + 1), 128)
        if _cdiv(b128, cand) % 2 == 0:
            tb = cand
    return tb


def kan_kernel(x_ref, w0_ref, w123_ref, b_ref, w4_ref, b4_ref, o_ref):
    """One (in_dim, TB) batch tile of the KAN forward pass, feature-major.

    Activations are (hidden, TB) f32 vregs with batch on the lane axis; dot
    inputs are bf16 with f32 accumulation; bias add / ReLU stay in f32 (v5e
    has no bf16 VPU path).  sigmoid(attn) scales are pre-folded into
    w2 / w3 / w4 by the wrapper.
    """
    f32 = jnp.float32
    bf16 = jnp.bfloat16

    # Layer 0: cast the f32 x tile to bf16 in VMEM (cheap VPU pack; avoids a
    # separate wrapper-side HBM pass over x).  K = in_dim = 17.
    h = jnp.dot(w0_ref[...], x_ref[...].astype(bf16),
                preferred_element_type=f32)
    h = jnp.maximum(h + b_ref[0], 0.0)

    # Hidden layers 1..3: W^T (hidden, hidden) @ h (hidden, TB); the MXU's N
    # dimension is the batch tile (full lane occupancy).
    for i in range(3):
        h = jnp.dot(w123_ref[i], h.astype(bf16), preferred_element_type=f32)
        h = jnp.maximum(h + b_ref[i + 1], 0.0)

    # Output layer (out_dim == 1): per-feature f32 scale + sublane reduce ->
    # lane-dense (1, TB) row, no cross-lane relayout, unmasked stores.
    y = jnp.sum(h * w4_ref[...], axis=0, keepdims=True) + b4_ref[0]
    o_ref[...] = y.astype(o_ref.dtype)


@functools.partial(jax.jit, static_argnames=("block_rows",))
def kan_forward(x, params, *, block_rows=2048):
    B, in_dim = x.shape
    hidden = params["w1"].shape[0]
    out_dim = params["w4"].shape[1]
    assert out_dim == 1, "kernel epilogue specializes to output_dim == 1"

    f32, bf16 = jnp.float32, jnp.bfloat16

    # Fold sigmoid attention scales into the next layer's weights (exact
    # algebra: (h * s) @ W == h @ (diag(s) @ W)); fold a2 into the output row.
    s0 = jax.nn.sigmoid(params["a0"]).reshape(hidden, 1)
    s1 = jax.nn.sigmoid(params["a1"]).reshape(hidden, 1)
    s2 = jax.nn.sigmoid(params["a2"]).reshape(hidden, 1)

    # Feature-major (transposed) weights: W^T is (out_features, in_features).
    w0t = params["w0"].T.astype(bf16)                              # (hidden, in_dim)
    w1t = params["w1"].T.astype(bf16)
    w2t = (params["w2"] * s0).T.astype(bf16)
    w3t = (params["w3"] * s1).T.astype(bf16)
    w123t = jnp.stack([w1t, w2t, w3t])                             # (3, hidden, hidden)
    w4col = (params["w4"] * s2).astype(f32)                        # (hidden, 1), f32
    b_stack = jnp.stack([params[f"b{i}"].reshape(hidden, 1).astype(f32)
                         for i in range(4)])                       # (4, hidden, 1)
    b4 = params["b4"].reshape(1).astype(f32)

    # Batch tiling along the lane axis; pad only when needed (padded columns
    # are garbage-safe: discarded by the final slice, never read elsewhere).
    tb = _pick_tile(B, block_rows)
    Bp = _round_up(B, tb)
    xt = x.astype(f32).T                                           # (in_dim, B) f32
    if Bp != B:
        xt = jnp.pad(xt, ((0, 0), (0, Bp - B)))

    grid = (Bp // tb,)

    out = pl.pallas_call(
        kan_kernel,
        out_shape=jax.ShapeDtypeStruct((1, Bp), f32),
        grid=grid,
        in_specs=[
            pl.BlockSpec((in_dim, tb), lambda i: (0, i)),              # x^T (streamed)
            pl.BlockSpec((hidden, in_dim), lambda i: (0, 0)),          # w0^T (resident)
            pl.BlockSpec((3, hidden, hidden), lambda i: (0, 0, 0)),    # w1..w3^T (resident)
            pl.BlockSpec((4, hidden, 1), lambda i: (0, 0, 0)),         # b0..b3 (resident)
            pl.BlockSpec((hidden, 1), lambda i: (0, 0)),               # folded w4 (resident)
            pl.BlockSpec(memory_space=pltpu.MemorySpace.SMEM),         # b4 scalar
        ],
        out_specs=pl.BlockSpec((1, tb), lambda i: (0, i)),
        compiler_params=pltpu.CompilerParams(
            dimension_semantics=("parallel",),
            vmem_limit_bytes=16 * 1024 * 1024,
        ),
    )(xt, w0t, w123t, b_stack, w4col, b4)

    return out[0, :B].reshape(B, out_dim)


def init_kan_params(key, input_dim=17, output_dim=1, hidden_dim=60,
                    num_hidden_layers=4):
    """Deterministic init mirroring the PyTorch module:
       Linear weights ~ xavier_normal, biases = 0, attn_weight ~ N(0,1).
       Linear weights are stored [in, out]; biases/attn as [1, F]."""
    params = {}
    keys = jax.random.split(key, num_hidden_layers + 1 + (num_hidden_layers - 1))
    k_iter = iter(keys)

    def xavier_normal(k, fan_in, fan_out):
        std = (2.0 / (fan_in + fan_out)) ** 0.5
        return std * jax.random.normal(k, (fan_in, fan_out), dtype=jnp.float32)

    params["w0"] = xavier_normal(next(k_iter), input_dim, hidden_dim)
    params["b0"] = jnp.zeros((1, hidden_dim), jnp.float32)

    for i in range(1, num_hidden_layers):
        params[f"w{i}"] = xavier_normal(next(k_iter), hidden_dim, hidden_dim)
        params[f"b{i}"] = jnp.zeros((1, hidden_dim), jnp.float32)

    params[f"w{num_hidden_layers}"] = xavier_normal(
        next(k_iter), hidden_dim, output_dim)
    params[f"b{num_hidden_layers}"] = jnp.zeros((1, output_dim), jnp.float32)

    for i in range(num_hidden_layers - 1):
        params[f"a{i}"] = jax.random.normal(
            next(k_iter), (1, hidden_dim), dtype=jnp.float32)

    return params


def kan_reference_f32(x, params):
    """Pure-f32 JAX reference with the original (unfused) forward semantics."""
    h = jnp.maximum(x @ params["w0"] + params["b0"], 0.0)
    for i in range(3):
        h = jnp.maximum(h @ params[f"w{i + 1}"] + params[f"b{i + 1}"], 0.0)
        h = h * jax.nn.sigmoid(params[f"a{i}"])
    return h @ params["w4"] + params["b4"]


def kan_reference_matched(x, params):
    """Pure-JAX reference using the same bf16-matmul-input / f32-accumulate
    scheme, attention fold and f32 output row as the kernel (tight-tolerance
    plumbing check; batch-major, mathematically identical)."""
    f32, bf16 = jnp.float32, jnp.bfloat16
    hidden = params["w1"].shape[0]
    s0 = jax.nn.sigmoid(params["a0"]).reshape(hidden, 1)
    s1 = jax.nn.sigmoid(params["a1"]).reshape(hidden, 1)
    s2 = jax.nn.sigmoid(params["a2"]).reshape(hidden, 1)
    w0 = params["w0"].astype(bf16)
    w1 = params["w1"].astype(bf16)
    w2 = (params["w2"] * s0).astype(bf16)
    w3 = (params["w3"] * s1).astype(bf16)
    w4row = (params["w4"] * s2)[:, 0].reshape(1, hidden).astype(f32)

    h = jnp.dot(x.astype(bf16), w0, preferred_element_type=f32)
    h = jnp.maximum(h + params["b0"], 0.0)
    for w, b in ((w1, params["b1"]), (w2, params["b2"]), (w3, params["b3"])):
        h = jnp.dot(h.astype(bf16), w, preferred_element_type=f32)
        h = jnp.maximum(h + b, 0.0)
    return jnp.sum(h * w4row, axis=1, keepdims=True) + params["b4"]


if __name__ == "__main__":
    key = jax.random.PRNGKey(0)
    k_param, k_x = jax.random.split(key)

    input_dim, output_dim, hidden_dim = 17, 1, 60
    batch = 300  # small demo: tile picker gives 2 grid steps of 256 rows + padding

    params = init_kan_params(k_param, input_dim=input_dim,
                             output_dim=output_dim, hidden_dim=hidden_dim,
                             num_hidden_layers=4)
    x = jax.random.normal(k_x, (batch, input_dim), dtype=jnp.float32)

    y = kan_forward(x, params)  # default block_rows (large tiles)
    jax.block_until_ready(y)
    assert y.shape == (batch, output_dim)

    # Tight check vs a reference using the same precision scheme as the kernel.
    y_matched = kan_reference_matched(x, params)
    assert jnp.allclose(y, y_matched, atol=2e-3, rtol=2e-3), \
        "mismatch vs precision-matched reference"

    # Loose sanity check vs the original f32 module semantics (bf16 matmul
    # inputs cause small, expected deviations).
    y_f32 = kan_reference_f32(x, params)
    assert jnp.allclose(y, y_f32, atol=5e-2, rtol=5e-2), \
        "mismatch vs f32 reference beyond bf16 tolerance"

    print("KERNEL_OK")
</pallas_src>

<mosaic_0001>
module attributes {stable_mosaic.version = 11 : i64} {
  func.func @kan_kernel(%arg0: i32, %arg1: memref<17x256xf32, #tpu.memory_space<vmem>>, %arg2: memref<60x17xbf16, #tpu.memory_space<vmem>>, %arg3: memref<3x60x60xbf16, #tpu.memory_space<vmem>>, %arg4: memref<4x60x1xf32, #tpu.memory_space<vmem>>, %arg5: memref<60x1xf32, #tpu.memory_space<vmem>>, %arg6: memref<1xf32, #tpu.memory_space<smem>>, %arg7: memref<1x256xf32, #tpu.memory_space<vmem>>) attributes {dimension_semantics = [#tpu.dimension_semantics<parallel>], iteration_bounds = array<i64: 2>, scalar_prefetch = 0 : i64, scratch_operands = 0 : i64, tpu.core_type = #tpu.core_type<tc>, window_params = [{transform_indices = @transform_0, window_bounds = array<i64: 17, 256>}, {pipeline_mode = #tpu.pipeline_mode<synchronous>, transform_indices = @transform_1, window_bounds = array<i64: 60, 17>}, {pipeline_mode = #tpu.pipeline_mode<synchronous>, transform_indices = @transform_2, window_bounds = array<i64: 3, 60, 60>}, {pipeline_mode = #tpu.pipeline_mode<synchronous>, transform_indices = @transform_3, window_bounds = array<i64: 4, 60, 1>}, {pipeline_mode = #tpu.pipeline_mode<synchronous>, transform_indices = @transform_4, window_bounds = array<i64: 60, 1>}, {transform_indices = @transform_5, window_bounds = array<i64: 1>}, {transform_indices = @transform_6, window_bounds = array<i64: 1, 256>}]} {
    %c0 = arith.constant 0 : index
    %c0_0 = arith.constant 0 : index
    %0 = vector.load %arg2[%c0, %c0_0] : memref<60x17xbf16, #tpu.memory_space<vmem>>, vector<60x17xbf16>
    %c0_1 = arith.constant 0 : index
    %c0_2 = arith.constant 0 : index
    %1 = vector.load %arg1[%c0_1, %c0_2] : memref<17x256xf32, #tpu.memory_space<vmem>>, vector<17x256xf32>
    %2 = arith.truncf %1 : vector<17x256xf32> to vector<17x256xbf16>
    %cst = arith.constant dense<0.000000e+00> : vector<60x256xf32>
    %3 = tpu.matmul %0, %2, %cst {dimension_numbers = #tpu.dot_dimension_numbers<[1], [0], [0], [1], [0, 0, 1, 1], [], []>} : vector<60x17xbf16>, vector<17x256xbf16>, vector<60x256xf32> -> vector<60x256xf32>
    %c0_3 = arith.constant 0 : index
    %c0_4 = arith.constant 0 : index
    %c0_5 = arith.constant 0 : index
    %4 = vector.load %arg4[%c0_3, %c0_4, %c0_5] : memref<4x60x1xf32, #tpu.memory_space<vmem>>, vector<1x60x1xf32>
    %5 = vector.shape_cast %4 : vector<1x60x1xf32> to vector<60x1xf32>
    %6 = vector.broadcast %5 : vector<60x1xf32> to vector<60x256xf32>
    %7 = arith.addf %3, %6 : vector<60x256xf32>
    %cst_6 = arith.constant 0.000000e+00 : f32
    %8 = vector.broadcast %cst_6 : f32 to vector<60x256xf32>
    %9 = arith.maximumf %7, %8 : vector<60x256xf32>
    %c0_7 = arith.constant 0 : index
    %c0_8 = arith.constant 0 : index
    %c0_9 = arith.constant 0 : index
    %10 = vector.load %arg3[%c0_7, %c0_8, %c0_9] : memref<3x60x60xbf16, #tpu.memory_space<vmem>>, vector<1x60x60xbf16>
    %11 = vector.shape_cast %10 : vector<1x60x60xbf16> to vector<60x60xbf16>
    %12 = arith.truncf %9 : vector<60x256xf32> to vector<60x256xbf16>
    %cst_10 = arith.constant dense<0.000000e+00> : vector<60x256xf32>
    %13 = tpu.matmul %11, %12, %cst_10 {dimension_numbers = #tpu.dot_dimension_numbers<[1], [0], [0], [1], [0, 0, 1, 1], [], []>} : vector<60x60xbf16>, vector<60x256xbf16>, vector<60x256xf32> -> vector<60x256xf32>
    %c1 = arith.constant 1 : index
    %c0_11 = arith.constant 0 : index
    %c0_12 = arith.constant 0 : index
    %14 = vector.load %arg4[%c1, %c0_11, %c0_12] : memref<4x60x1xf32, #tpu.memory_space<vmem>>, vector<1x60x1xf32>
    %15 = vector.shape_cast %14 : vector<1x60x1xf32> to vector<60x1xf32>
    %16 = vector.broadcast %15 : vector<60x1xf32> to vector<60x256xf32>
    %17 = arith.addf %13, %16 : vector<60x256xf32>
    %cst_13 = arith.constant 0.000000e+00 : f32
    %18 = vector.broadcast %cst_13 : f32 to vector<60x256xf32>
    %19 = arith.maximumf %17, %18 : vector<60x256xf32>
    %c1_14 = arith.constant 1 : index
    %c0_15 = arith.constant 0 : index
    %c0_16 = arith.constant 0 : index
    %20 = vector.load %arg3[%c1_14, %c0_15, %c0_16] : memref<3x60x60xbf16, #tpu.memory_space<vmem>>, vector<1x60x60xbf16>
    %21 = vector.shape_cast %20 : vector<1x60x60xbf16> to vector<60x60xbf16>
    %22 = arith.truncf %19 : vector<60x256xf32> to vector<60x256xbf16>
    %cst_17 = arith.constant dense<0.000000e+00> : vector<60x256xf32>
    %23 = tpu.matmul %21, %22, %cst_17 {dimension_numbers = #tpu.dot_dimension_numbers<[1], [0], [0], [1], [0, 0, 1, 1], [], []>} : vector<60x60xbf16>, vector<60x256xbf16>, vector<60x256xf32> -> vector<60x256xf32>
    %c2 = arith.constant 2 : index
    %c0_18 = arith.constant 0 : index
    %c0_19 = arith.constant 0 : index
    %24 = vector.load %arg4[%c2, %c0_18, %c0_19] : memref<4x60x1xf32, #tpu.memory_space<vmem>>, vector<1x60x1xf32>
    %25 = vector.shape_cast %24 : vector<1x60x1xf32> to vector<60x1xf32>
    %26 = vector.broadcast %25 : vector<60x1xf32> to vector<60x256xf32>
    %27 = arith.addf %23, %26 : vector<60x256xf32>
    %cst_20 = arith.constant 0.000000e+00 : f32
    %28 = vector.broadcast %cst_20 : f32 to vector<60x256xf32>
    %29 = arith.maximumf %27, %28 : vector<60x256xf32>
    %c2_21 = arith.constant 2 : index
    %c0_22 = arith.constant 0 : index
    %c0_23 = arith.constant 0 : index
    %30 = vector.load %arg3[%c2_21, %c0_22, %c0_23] : memref<3x60x60xbf16, #tpu.memory_space<vmem>>, vector<1x60x60xbf16>
    %31 = vector.shape_cast %30 : vector<1x60x60xbf16> to vector<60x60xbf16>
    %32 = arith.truncf %29 : vector<60x256xf32> to vector<60x256xbf16>
    %cst_24 = arith.constant dense<0.000000e+00> : vector<60x256xf32>
    %33 = tpu.matmul %31, %32, %cst_24 {dimension_numbers = #tpu.dot_dimension_numbers<[1], [0], [0], [1], [0, 0, 1, 1], [], []>} : vector<60x60xbf16>, vector<60x256xbf16>, vector<60x256xf32> -> vector<60x256xf32>
    %c3 = arith.constant 3 : index
    %c0_25 = arith.constant 0 : index
    %c0_26 = arith.constant 0 : index
    %34 = vector.load %arg4[%c3, %c0_25, %c0_26] : memref<4x60x1xf32, #tpu.memory_space<vmem>>, vector<1x60x1xf32>
    %35 = vector.shape_cast %34 : vector<1x60x1xf32> to vector<60x1xf32>
    %36 = vector.broadcast %35 : vector<60x1xf32> to vector<60x256xf32>
    %37 = arith.addf %33, %36 : vector<60x256xf32>
    %cst_27 = arith.constant 0.000000e+00 : f32
    %38 = vector.broadcast %cst_27 : f32 to vector<60x256xf32>
    %39 = arith.maximumf %37, %38 : vector<60x256xf32>
    %c0_28 = arith.constant 0 : index
    %c0_29 = arith.constant 0 : index
    %40 = vector.load %arg5[%c0_28, %c0_29] : memref<60x1xf32, #tpu.memory_space<vmem>>, vector<60x1xf32>
    %41 = vector.broadcast %40 : vector<60x1xf32> to vector<60x256xf32>
    %42 = arith.mulf %39, %41 : vector<60x256xf32>
    %cst_30 = arith.constant dense<0.000000e+00> : vector<256xf32>
    %43 = vector.multi_reduction <add>, %42, %cst_30 [0] : vector<60x256xf32> to vector<256xf32>
    %44 = vector.shape_cast %43 : vector<256xf32> to vector<1x256xf32>
    %c0_31 = arith.constant 0 : index
    %45 = memref.load %arg6[%c0_31] : memref<1xf32, #tpu.memory_space<smem>>
    %46 = vector.broadcast %45 : f32 to vector<1x256xf32>
    %47 = arith.addf %44, %46 : vector<1x256xf32>
    %c0_32 = arith.constant 0 : index
    %c0_33 = arith.constant 0 : index
    %48 = vector.load %arg7[%c0_32, %c0_33] : memref<1x256xf32, #tpu.memory_space<vmem>>, vector<1x256xf32>
    tpu.vector_store %arg7[%c0_32, %c0_33], %47 {strides = array<i32>} : memref<1x256xf32, #tpu.memory_space<vmem>>, vector<1x256xf32>,
    return
  }
  func.func @transform_0(%arg0: i32) -> (i32, i32) {
    %c0_i32 = arith.constant 0 : i32
    %c0_i32_0 = arith.constant 0 : i32
    return %c0_i32, %arg0 : i32, i32
  }
  func.func @transform_1(%arg0: i32) -> (i32, i32) {
    %c0_i32 = arith.constant 0 : i32
    %c0_i32_0 = arith.constant 0 : i32
    %c0_i32_1 = arith.constant 0 : i32
    return %c0_i32, %c0_i32_0 : i32, i32
  }
  func.func @transform_2(%arg0: i32) -> (i32, i32, i32) {
    %c0_i32 = arith.constant 0 : i32
    %c0_i32_0 = arith.constant 0 : i32
    %c0_i32_1 = arith.constant 0 : i32
    %c0_i32_2 = arith.constant 0 : i32
    return %c0_i32, %c0_i32_0, %c0_i32_1 : i32, i32, i32
  }
  func.func @transform_3(%arg0: i32) -> (i32, i32, i32) {
    %c0_i32 = arith.constant 0 : i32
    %c0_i32_0 = arith.constant 0 : i32
    %c0_i32_1 = arith.constant 0 : i32
    %c0_i32_2 = arith.constant 0 : i32
    return %c0_i32, %c0_i32_0, %c0_i32_1 : i32, i32, i32
  }
  func.func @transform_4(%arg0: i32) -> (i32, i32) {
    %c0_i32 = arith.constant 0 : i32
    %c0_i32_0 = arith.constant 0 : i32
    %c0_i32_1 = arith.constant 0 : i32
    return %c0_i32, %c0_i32_0 : i32, i32
  }
  func.func @transform_5(%arg0: i32) -> i32 {
    %c0_i32 = arith.constant 0 : i32
    %c0_i32_0 = arith.constant 0 : i32
    return %c0_i32 : i32
  }
  func.func @transform_6(%arg0: i32) -> (i32, i32) {
    %c0_i32 = arith.constant 0 : i32
    %c0_i32_0 = arith.constant 0 : i32
    return %c0_i32, %arg0 : i32, i32
  }
}

</mosaic_0001>

<bundles_post_ra>
// kernel: kan_forward.1
= control target key start
LH: loop header
LB: loop body
LE: loop exit
PB: predicated region body
PF: predicated region fallthrough
CT: control target
= control target key end

     0   :  { %s1692_s0 = inlined_call_operand.vmem [shape: f32[17,512], index: 0, kind: input, shape index: {}]   ;;  %s1693_s1 = inlined_call_operand.vmem [shape: bf16[60,17], index: 1, kind: input, shape index: {}]   ;;  %s1694_s2 = inlined_call_operand.vmem [shape: bf16[3,60,60], index: 2, kind: input, shape index: {}]   ;;  %s1695_s3 = inlined_call_operand.vmem [shape: f32[4,60,1], index: 3, kind: input, shape index: {}]   ;;  %s1696_s4 = inlined_call_operand.vmem [shape: f32[60,1], index: 4, kind: input, shape index: {}]   ;;  %s1697_s5 = inlined_call_operand.<no memory space> [shape: f32[1], index: 5, kind: input, shape index: {}]   ;;  %s1698_s6 = inlined_call_operand.vmem [shape: f32[1,512], index: 6, kind: output, shape index: {}]  }
   0x1   :  { %11 = sst [smem:[#allocation2]] %s1697_s5 }
   0x2   :  { %s1420_s23 = smov 0   ;;  %s1422_s24 = smov 0  }
   0x3   :  { %s1424_s25 = smov 0  }
   0x4 LB: > { %s1164_s5 = sadd.s32 4294967295, %s1379_s25   ;;  %s1437_s26 = sadd.s32 1, %s1379_s25   ;;  %s1379_s25 = sphi %s1424_s25, %s1701_s25   ;;  %s1375_s24 = sphi %s1422_s24, %s1700_s24   ;;  %s1371_s23 = sphi %s1420_s23, %s1699_s23  }
   0x5   : > { %s21_s27 = ssub.s32 %s1379_s25, %s1437_s26  ;;  %s24_s28 = sadd.s32 1, %s1375_s24 }
   0x6   : > { %p22_p0 = scmp.eq.s32.totalorder %s21_s27, 0  ;;  %p31_p1 = scmp.ne.s32.totalorder %s1375_s24, %s1371_s23 }
   0x7   : > { %p32_p2 = scmp.eq.s32.totalorder %s1379_s25, 0  ;;  %p1167_p4 = scmp.ge.s32.totalorder %s1379_s25, 2 }
   0x8   : > { %s1446_s29 = scalar_select %p22_p0, %s1375_s24, %s24_s28  }
   0x9   : > { %p33_p3 = por %p32_p2, %p31_p1  ;;  %203 = sbr.rel (%p1167_p4) target bundleno = 24 (0x18), region = 36 }
   0xe   : > { %206 = sbr.rel (!%p33_p3) target bundleno = 24 (0x18), region = 40  ;;  %s208_s30 = sand.u32 (%p33_p3), 1, %s1375_s24  }
   0xf   : > { %s1310_s7 = sshll.u32 (%p33_p3), %s1379_s25, 4  ;;  %s1327_s8 = smul.u32 (%p33_p3), 48, %s208_s30 }
  0x10   : > { %s213_s11 = scalar_lea.vmem (%p33_p3), %s1692_s0, %s1310_s7 }
  0x11   : > { %v226_v0 = vld [vmem:[%s213_s11] sm:$0xff] (%p33_p3)  ;;  %v228_v1 = vld [vmem:[%s213_s11 + $0x8] sm:$0xff] (%p33_p3)  ;;  %s210_s12 = scalar_lea.vmem (%p33_p3), [#allocation3], %s1327_s8 }
  0x12   : > { %v230_v2 = vld [vmem:[%s213_s11 + $0x20] sm:$0xff] (%p33_p3)  ;;  %227 = vst [vmem:[%s210_s12] sm:$0xff] (%p33_p3), %v226_v0  ;;  %v232_v3 = vld [vmem:[%s213_s11 + $0x28] sm:$0xff] (%p33_p3) }
  0x13   : > { %229 = vst [vmem:[%s210_s12 + $0x8] sm:$0xff] %v228_v1  ;;  %v234_v4 = vld [vmem:[%s213_s11 + $0x40] sm:$0xff]  ;;  %v236_v5 = vld [vmem:[%s213_s11 + $0x48] sm:$0xff] }
  0x14   : > { %231 = vst [vmem:[%s210_s12 + $0x10] sm:$0xff] %v230_v2 }
  0x15   : > { %233 = vst [vmem:[%s210_s12 + $0x18] sm:$0xff] %v232_v3 }
  0x16   : > { %235 = vst [vmem:[%s210_s12 + $0x20] sm:$0xff] %v234_v4 }
  0x17   : > { %237 = vst [vmem:[%s210_s12 + $0x28] sm:$0xff] %v236_v5 }
  0x18 PF: > { %p1170_p5 = scmp.ge.s32.totalorder %s1379_s25, 1  ;;  %p242_p6 = scmp.lt.s32.totalorder %s1379_s25, 3 }
  0x1a   : > { %p243_p7 = pnand %p1170_p5, %p242_p6 }
  0x1b   : > { %s249_s17 = sand.u32 (!%p243_p7), 1, %s1371_s23   ;;  %s1094_s16 = sld [smem:[#allocation2]] (!%p243_p7) }
  0x1c   : > { %246 = sbr.rel (%p243_p7) target bundleno = 878 (0x36e), region = 63 }
  0x1d   : > { %s1328_s18 = smul.u32 (!%p243_p7), 48, %s249_s17  ;;  %s1171_s17 = sshll.u32 (!%p243_p7), %s1164_s5, 1 }
  0x1e   : > { %p279_p8 = scmp.lt.s32.totalorder (!%p243_p7), %s1171_s17, 3 }
  0x1f   : > { %s251_s21 = scalar_lea.vmem (!%p243_p7), [#allocation3], %s1328_s18 }
  0x21   : > { %v308_v6 = vld [vmem:[%s1695_s3 + $0x30] sm:$0xff]  ;;  %v306_v7 = vld [vmem:[%s1695_s3 + $0x20] sm:$0xff]  ;;  %v1381_v8 = vmov 0   ;;  %vm383_vm0 = vcmask 1040384   ;;  %v297_v12 = vld [vmem:[%s251_s21 + $0x28] sm:$0x1] }
  0x22   : > { %1355 = vset.pattern.permute.xlu1 %v1381_v8  ;;  %1354 = vset.pattern.permute.xlu0 %v1381_v8  ;;  %v304_v9 = vld [vmem:[%s1695_s3 + $0x10] sm:$0xff]  ;;  %v385_v11 = vsel %vm383_vm0, 65535, %v1381_v8  ;;  %v301_v14 = vpack.c.bf16 %v297_v12, %v297_v12  ;;  %v293_v17 = vld [vmem:[%s251_s21 + $0x8] sm:$0xff]  ;;  %v295_v18 = vld [vmem:[%s251_s21 + $0x18] sm:$0xff]  ;;  %vm370_vm1 = vcmask 138240   ;;  %vm564_vm2 = vcmask 1045504  }
  0x23   : > { %342 = vperm.xlu0 %1354, %v308_v6   ;;  %332 = vperm.xlu1 %1355, %v306_v7   ;;  %v296_v10 = vld [vmem:[%s251_s21 + $0x20] sm:$0x1]  ;;  %v294_v16 = vld [vmem:[%s251_s21 + $0x10] sm:$0xff]  ;;  %v309_v21 = vld [vmem:[%s1695_s3 + $0x38] sm:$0xf]  ;;  %v299_v24 = vpack.c.bf16 %v295_v18, %v293_v17  ;;  %vm551_vm3 = vcmask 490496  }
  0x24   : > { %1356 = vset.pattern.permute.xlu2 %v1381_v8  ;;  %v300_v13 = vpack.c.bf16 %v296_v10, %v296_v10  ;;  %v292_v15 = vld [vmem:[%s251_s21] sm:$0xff]  ;;  %v390_v20 = vand.u32 %v385_v11, %v301_v14  ;;  %v307_v22 = vld [vmem:[%s1695_s3 + $0x28] sm:$0xff]  ;;  %v305_v25 = vld [vmem:[%s1695_s3 + $0x18] sm:$0xff]  ;;  %vm1071_vm4 = vcmask 1043456   ;;  %s1703_s17 = smov (!%p279_p8, %s1171_s17), 3 }
  0x25   : > { %322 = vperm.xlu2 %1356, %v304_v9   ;;  %v298_v23 = vpack.c.bf16 %v294_v16, %v292_v15  ;;  %v1311_v26 = vld [vmem:[%s1693_s1] sm:$0xff]  ;;  %v303_v27 = vld [vmem:[%s1695_s3 + $0x8] sm:$0xff]  ;;  %v1202_v29 = vld [vmem:[%s1695_s3 + $0x70] sm:$0xff]  ;;  %s281_s20 = scalar_lea.vmem %s1698_s6, %s1703_s17 }
  0x26   : > { %v387_v19 = vand.u32 %v385_v11, %v300_v13  ;;  %427 = vmatpush.bf16.msra.mxu1 %v390_v20  ;;  %v302_v28 = vld [vmem:[%s1695_s3] sm:$0xff]  ;;  %v1203_v31 = vld [vmem:[%s1695_s3 + $0x78] sm:$0xf]  ;;  %v1201_v32 = vld [vmem:[%s1695_s3 + $0x68] sm:$0xff] }
  0x27   : > { %v1200_v30 = vld [vmem:[%s1695_s3 + $0x60] sm:$0xff]  ;;  %v1312_v33 = vld [vmem:[%s1693_s1 + $0x8] sm:$0xff]  ;;  %v1199_v34 = vld [vmem:[%s1695_s3 + $0x58] sm:$0xff] }
  0x28   : > { %398 = vmatpush.bf16.msra.mxu0 %v387_v19  ;;  %v1198_v35 = vld [vmem:[%s1695_s3 + $0x50] sm:$0xff]  ;;  %v1196_v36 = vld [vmem:[%s1695_s3 + $0x40] sm:$0xff]  ;;  %v1197_v38 = vld [vmem:[%s1695_s3 + $0x48] sm:$0xff] }
  0x29   : > { %v1242_v37 = vld [vmem:[%s1695_s3 + $0xb0] sm:$0xff]  ;;  %v1243_v39 = vld [vmem:[%s1695_s3 + $0xb8] sm:$0xf]  ;;  %v1241_v41 = vld [vmem:[%s1695_s3 + $0xa8] sm:$0xff] }
  0x2a   : > { %428 = vmatpush.bf16.msra.mxu1 %v299_v24  ;;  %v1313_v40 = vld [vmem:[%s1693_s1 + $0x10] sm:$0xff]  ;;  %v1240_v42 = vld [vmem:[%s1695_s3 + $0xa0] sm:$0xff]  ;;  %v1239_v45 = vld [vmem:[%s1695_s3 + $0x98] sm:$0xff] }
  0x2b   : > { %347 = vperm.xlu0 %1354, %v309_v21   ;;  %337 = vperm.xlu1 %1355, %v307_v22   ;;  %v1238_v43 = vld [vmem:[%s1695_s3 + $0x90] sm:$0xff]  ;;  %v1236_v44 = vld [vmem:[%s1695_s3 + $0x80] sm:$0xff]  ;;  %v1186_v46 = vld [vmem:[%s1693_s1 + $0x18] sm:$0xf] }
  0x2c   : > { %399 = vmatpush.bf16.msra.mxu0 %v298_v23  ;;  %v1314_v47 = vld [vmem:[%s1693_s1 + $0x18] sm:$0x30]  ;;  %v1237_v48 = vld [vmem:[%s1695_s3 + $0x88] sm:$0xff]  ;;  %v1276_v51 = vld [vmem:[%s1695_s3 + $0xc0] sm:$0xff] }
  0x2d   : > { %327 = vperm.xlu2 %1356, %v305_v25   ;;  %1192 = vmatmul.msk.bf16.vlgmr.msra.gmra.mxu1 %vm370_vm1, %v1311_v26  ;;  %v1187_v49 = vor.u32 %v1314_v47, %v1186_v46  ;;  %v1277_v50 = vld [vmem:[%s1695_s3 + $0xc8] sm:$0xff]  ;;  %v1278_v52 = vld [vmem:[%s1695_s3 + $0xd0] sm:$0xff]  ;;  %v1001_v53 = vld [vmem:[%s1696_s4] sm:$0xff] }
  0x2e   : > { %v1279_v54 = vld [vmem:[%s1695_s3 + $0xd8] sm:$0xff]  ;;  %v1002_v55 = vld [vmem:[%s1696_s4 + $0x8] sm:$0xff]  ;;  %v1003_v56 = vld [vmem:[%s1696_s4 + $0x10] sm:$0xff] }
  0x2f   : > { %1188 = vmatmul.msk.bf16.vlgmr.msra.gmra.mxu0 %vm370_vm1, %v1311_v26  ;;  %v1280_v57 = vld [vmem:[%s1695_s3 + $0xe0] sm:$0xff]  ;;  %v1281_v58 = vld [vmem:[%s1695_s3 + $0xe8] sm:$0xff]  ;;  %v1282_v59 = vld [vmem:[%s1695_s3 + $0xf0] sm:$0xff] }
  0x30   : > { %v1004_v60 = vld [vmem:[%s1696_s4 + $0x18] sm:$0xff]  ;;  %v1005_v61 = vld [vmem:[%s1696_s4 + $0x20] sm:$0xff]  ;;  %v1006_v62 = vld [vmem:[%s1696_s4 + $0x28] sm:$0xff] }
  0x31   : > { %v1283_v63 = vld [vmem:[%s1695_s3 + $0xf8] sm:$0xf]  ;;  %v1007_v0 = vld [vmem:[%s1696_s4 + $0x30] sm:$0xff] }
  0x32   : > { %v1008_v1 = vld [vmem:[%s1696_s4 + $0x38] sm:$0xf] }
  0x33   : > { %317 = vperm.xlu1 %1355, %v303_v27   ;;  %312 = vperm.xlu0 %1354, %v302_v28  }
  0x35   : > { %523 = vperm.xlu2 %1356, %v1202_v29  }
  0x3b   : > { %513 = vperm.xlu1 %1355, %v1200_v30   ;;  %528 = vperm.xlu0 %1354, %v1203_v31  }
  0x3d   : > { %518 = vperm.xlu2 %1356, %v1201_v32   ;;  %1193 = vmatmul.msk.bf16.gmra.mxu1 %vm370_vm1, %v1312_v33 }
  0x3f   : > { %1189 = vmatmul.msk.bf16.gmra.mxu0 %vm370_vm1, %v1312_v33 }
  0x43   : > { %508 = vperm.xlu1 %1355, %v1199_v34   ;;  %503 = vperm.xlu0 %1354, %v1198_v35  }
  0x45   : > { %493 = vperm.xlu2 %1356, %v1196_v36  }
  0x4b   : > { %703 = vperm.xlu1 %1355, %v1242_v37   ;;  %498 = vperm.xlu0 %1354, %v1197_v38  }
  0x4d   : > { %708 = vperm.xlu2 %1356, %v1243_v39   ;;  %1194 = vmatmul.msk.bf16.gmra.mxu1 %vm370_vm1, %v1313_v40 }
  0x4f   : > { %1190 = vmatmul.msk.bf16.gmra.mxu0 %vm370_vm1, %v1313_v40 }
  0x53   : > { %698 = vperm.xlu1 %1355, %v1241_v41   ;;  %693 = vperm.xlu0 %1354, %v1240_v42  }
  0x55   : > { %683 = vperm.xlu2 %1356, %v1238_v43  }
  0x5b   : > { %673 = vperm.xlu1 %1355, %v1236_v44   ;;  %688 = vperm.xlu0 %1354, %v1239_v45  }
  0x5d   : > { %678 = vperm.xlu2 %1356, %v1237_v48   ;;  %1195 = vmatmul.msk.bf16.gmra.mxu1 %vm370_vm1, %v1187_v49 }
  0x5f   : > { %1191 = vmatmul.msk.bf16.gmra.mxu0 %vm370_vm1, %v1187_v49 }
  0x63   : > { %856 = vperm.xlu1 %1355, %v1277_v50   ;;  %851 = vperm.xlu0 %1354, %v1276_v51  }
  0x65   : > { %861 = vperm.xlu2 %1356, %v1278_v52  }
  0x6b   : > { %1011 = vperm.xlu1 %1355, %v1001_v53   ;;  %866 = vperm.xlu0 %1354, %v1279_v54  }
  0x6d   : > { %1016 = vperm.xlu2 %1356, %v1002_v55  }
  0x73   : > { %1021 = vperm.xlu1 %1355, %v1003_v56   ;;  %871 = vperm.xlu0 %1354, %v1280_v57  }
  0x75   : > { %876 = vperm.xlu2 %1356, %v1281_v58  }
  0x7b   : > { %881 = vperm.xlu1 %1355, %v1282_v59   ;;  %1026 = vperm.xlu0 %1354, %v1004_v60  }
  0x7d   : > { %1031 = vperm.xlu2 %1356, %v1005_v61  }
  0x7f   : > { %v323_v18 = vpop.permute.xlu2 %322 }
  0x83   : > { %1036 = vperm.xlu1 %1355, %v1006_v62   ;;  %886 = vperm.xlu0 %1354, %v1283_v63  }
  0x85   : > { %1041 = vperm.xlu2 %1356, %v1007_v0  }
  0x87   : > { %v328_v35 = vpop.permute.xlu2 %327 }
  0x8b   : > { %1046 = vperm.xlu0 %1354, %v1008_v1  }
  0x95   : > { %v333_v14 = vpop.permute.xlu1 %332  ;;  %v343_v15 = vpop.permute.xlu0 %342 }
  0x9d   : > { %v338_v19 = vpop.permute.xlu1 %337  ;;  %v348_v20 = vpop.permute.xlu0 %347 }
  0xa5   : > { %v318_v44 = vpop.permute.xlu1 %317  ;;  %v313_v55 = vpop.permute.xlu0 %312 }
  0xaa   : > { %v430_v3 = vpop.f32.mrf.mxu1 }
  0xab   : > { %v431_v57 = vadd.f32 %v430_v3, %v313_v55  ;;  %v1317_v3 = vld [vmem:[%s1694_s2 + $0x10] sm:$0xff] }
  0xac   : > { %v401_v2 = vpop.f32.mrf.mxu0 }
  0xad   : > { %v402_v56 = vadd.f32 %v401_v2, %v313_v55  ;;  %v451_v1 = vmax.f32 %v431_v57, 0.0  ;;  %v1316_v2 = vld [vmem:[%s1694_s2 + $0x8] sm:$0xff] }
  0xaf   : > { %v450_v0 = vmax.f32 %v402_v56, 0.0 }
  0xb2   : > { %v432_v5 = vpop.f32.mrf.mxu1 }
  0xb3   : > { %v433_v50 = vadd.f32 %v432_v5, %v318_v44 }
  0xb4   : > { %v403_v4 = vpop.f32.mrf.mxu0 }
  0xb5   : > { %v404_v49 = vadd.f32 %v403_v4, %v318_v44  ;;  %v453_v61 = vmax.f32 %v433_v50, 0.0 }
  0xb7   : > { %v452_v60 = vmax.f32 %v404_v49, 0.0  ;;  %v475_v5 = vpack.c.bf16 %v453_v61, %v451_v1 }
  0xb9   : > { %v474_v4 = vpack.c.bf16 %v452_v60, %v450_v0 }
  0xba   : > { %v435_v7 = vpop.f32.mrf.mxu1 }
  0xbb   : > { %v436_v46 = vadd.f32 %v435_v7, %v323_v18  ;;  %v1218_v7 = vld [vmem:[%s1694_s2 + $0x18] sm:$0xf] }
  0xbc   : > { %v406_v6 = vpop.f32.mrf.mxu0 }
  0xbd   : > { %v407_v45 = vadd.f32 %v406_v6, %v323_v18  ;;  %v455_v59 = vmax.f32 %v436_v46, 0.0  ;;  %v1315_v6 = vld [vmem:[%s1694_s2] sm:$0xff] }
  0xbf   : > { %v454_v58 = vmax.f32 %v407_v45, 0.0 }
  0xc2   : > { %v437_v9 = vpop.f32.mrf.mxu1 }
  0xc3   : > { %v438_v39 = vadd.f32 %v437_v9, %v328_v35 }
  0xc4   : > { %v408_v8 = vpop.f32.mrf.mxu0 }
  0xc5   : > { %v409_v38 = vadd.f32 %v408_v8, %v328_v35  ;;  %v457_v52 = vmax.f32 %v438_v39, 0.0  ;;  %v1318_v8 = vld [vmem:[%s1694_s2 + $0x18] sm:$0x30] }
  0xc6   : > { %v1219_v9 = vor.u32 %v1318_v8, %v1218_v7 }
  0xc7   : > { %v456_v51 = vmax.f32 %v409_v38, 0.0  ;;  %v477_v63 = vpack.c.bf16 %v457_v52, %v455_v59 }
  0xc9   : > { %v476_v62 = vpack.c.bf16 %v456_v51, %v454_v58 }
  0xca   : > { %v440_v11 = vpop.f32.mrf.mxu1 }
  0xcb   : > { %v441_v34 = vadd.f32 %v440_v11, %v333_v14 }
  0xcc   : > { %v411_v10 = vpop.f32.mrf.mxu0 }
  0xcd   : > { %v412_v33 = vadd.f32 %v411_v10, %v333_v14  ;;  %v459_v48 = vmax.f32 %v441_v34, 0.0 }
  0xcf   : > { %v458_v47 = vmax.f32 %v412_v33, 0.0 }
  0xd2   : > { %v442_v13 = vpop.f32.mrf.mxu1 }
  0xd3   : > { %v443_v28 = vadd.f32 %v442_v13, %v338_v19 }
  0xd4   : > { %v413_v12 = vpop.f32.mrf.mxu0 }
  0xd5   : > { %v414_v27 = vadd.f32 %v413_v12, %v338_v19  ;;  %v461_v41 = vmax.f32 %v443_v28, 0.0 }
  0xd7   : > { %v460_v40 = vmax.f32 %v414_v27, 0.0  ;;  %v479_v54 = vpack.c.bf16 %v461_v41, %v459_v48 }
  0xd9   : > { %v478_v53 = vpack.c.bf16 %v460_v40, %v458_v47 }
  0xda   : > { %v445_v17 = vpop.f32.mrf.mxu1 }
  0xdb   : > { %v446_v22 = vadd.f32 %v445_v17, %v343_v15 }
  0xdc   : > { %v416_v16 = vpop.f32.mrf.mxu0 }
  0xdd   : > { %v417_v21 = vadd.f32 %v416_v16, %v343_v15  ;;  %v463_v30 = vmax.f32 %v446_v22, 0.0  ;;  %v529_v22 = vpop.permute.xlu0 %528 }
  0xdf   : > { %v462_v29 = vmax.f32 %v417_v21, 0.0 }
  0xe2   : > { %v447_v24 = vpop.f32.mrf.mxu1 }
  0xe3   : > { %v448_v26 = vadd.f32 %v447_v24, %v348_v20 }
  0xe4   : > { %v418_v23 = vpop.f32.mrf.mxu0 }
  0xe5   : > { %v419_v25 = vadd.f32 %v418_v23, %v348_v20  ;;  %v465_v32 = vmax.f32 %v448_v26, 0.0  ;;  %v524_v23 = vpop.permute.xlu2 %523  ;;  %v514_v26 = vpop.permute.xlu1 %513 }
  0xe6   : > { %v504_v27 = vpop.permute.xlu0 %503 }
  0xe7   : > { %v464_v31 = vmax.f32 %v419_v25, 0.0  ;;  %v481_v37 = vpack.c.bf16 %v465_v32, %v463_v30 }
  0xe9   : > { %v480_v36 = vpack.c.bf16 %v464_v31, %v462_v29  ;;  %v569_v43 = vsel %vm564_vm2, %v481_v37, 0 }
  0xea   : > { %604 = vmatpush.bf16.msra.mxu3 %v569_v43 }
  0xeb   : > { %v566_v42 = vsel %vm564_vm2, %v480_v36, 0 }
  0xec   : > { %575 = vmatpush.bf16.msra.mxu2 %v566_v42 }
  0xed   : > { %v519_v32 = vpop.permute.xlu2 %518  ;;  %v509_v43 = vpop.permute.xlu1 %508 }
  0xee   : > { %605 = vmatpush.bf16.msra.mxu3 %v479_v54  ;;  %v499_v52 = vpop.permute.xlu0 %498 }
  0xf0   : > { %576 = vmatpush.bf16.msra.mxu2 %v478_v53 }
  0xf2   : > { %606 = vmatpush.bf16.msra.mxu3 %v477_v63 }
  0xf4   : > { %577 = vmatpush.bf16.msra.mxu2 %v476_v62 }
  0xf5   : > { %v494_v63 = vpop.permute.xlu2 %493 }
  0xf6   : > { %607 = vmatpush.bf16.msra.mxu3 %v475_v5 }
  0xf8   : > { %578 = vmatpush.bf16.msra.mxu2 %v474_v4 }
  0xf9   : > { %1224 = vmatmul.msk.bf16.vlgmr.msra.gmra.mxu3 %vm551_vm3, %v1315_v6 }
  0xfb   : > { %1220 = vmatmul.msk.bf16.vlgmr.msra.gmra.mxu2 %vm551_vm3, %v1315_v6 }
 0x109   : > { %1225 = vmatmul.msk.bf16.gmra.mxu3 %vm551_vm3, %v1316_v2 }
 0x10b   : > { %1221 = vmatmul.msk.bf16.gmra.mxu2 %vm551_vm3, %v1316_v2 }
 0x119   : > { %1226 = vmatmul.msk.bf16.gmra.mxu3 %vm551_vm3, %v1317_v3 }
 0x11b   : > { %1222 = vmatmul.msk.bf16.gmra.mxu2 %vm551_vm3, %v1317_v3 }
 0x129   : > { %1227 = vmatmul.msk.bf16.gmra.mxu3 %vm551_vm3, %v1219_v9 }
 0x12b   : > { %1223 = vmatmul.msk.bf16.gmra.mxu2 %vm551_vm3, %v1219_v9 }
 0x17c   : > { %v609_v11 = vpop.f32.mrf.mxu3 }
 0x17d   : > { %v610_v1 = vadd.f32 %v609_v11, %v494_v63  ;;  %v1321_v11 = vld [vmem:[%s1694_s2 + $0x30] sm:$0xff] }
 0x17e   : > { %v580_v10 = vpop.f32.mrf.mxu2 }
 0x17f   : > { %v581_v0 = vadd.f32 %v580_v10, %v494_v63  ;;  %v630_v9 = vmax.f32 %v610_v1, 0.0  ;;  %v1320_v10 = vld [vmem:[%s1694_s2 + $0x28] sm:$0xff] }
 0x181   : > { %v629_v8 = vmax.f32 %v581_v0, 0.0 }
 0x184   : > { %v611_v13 = vpop.f32.mrf.mxu3 }
 0x185   : > { %v612_v58 = vadd.f32 %v611_v13, %v499_v52 }
 0x186   : > { %v582_v12 = vpop.f32.mrf.mxu2 }
 0x187   : > { %v583_v57 = vadd.f32 %v582_v12, %v499_v52  ;;  %v632_v2 = vmax.f32 %v612_v58, 0.0 }
 0x189   : > { %v631_v6 = vmax.f32 %v583_v57, 0.0  ;;  %v655_v13 = vpack.c.bf16 %v632_v2, %v630_v9 }
 0x18b   : > { %v654_v12 = vpack.c.bf16 %v631_v6, %v629_v8 }
 0x18c   : > { %v614_v15 = vpop.f32.mrf.mxu3 }
 0x18d   : > { %v615_v54 = vadd.f32 %v614_v15, %v504_v27  ;;  %v1258_v15 = vld [vmem:[%s1694_s2 + $0x38] sm:$0xf] }
 0x18e   : > { %v585_v14 = vpop.f32.mrf.mxu2 }
 0x18f   : > { %v586_v53 = vadd.f32 %v585_v14, %v504_v27  ;;  %v634_v5 = vmax.f32 %v615_v54, 0.0  ;;  %v1319_v14 = vld [vmem:[%s1694_s2 + $0x20] sm:$0xff] }
 0x191   : > { %v633_v4 = vmax.f32 %v586_v53, 0.0 }
 0x194   : > { %v616_v17 = vpop.f32.mrf.mxu3 }
 0x195   : > { %v617_v47 = vadd.f32 %v616_v17, %v509_v43 }
 0x196   : > { %v587_v16 = vpop.f32.mrf.mxu2 }
 0x197   : > { %v588_v46 = vadd.f32 %v587_v16, %v509_v43  ;;  %v636_v60 = vmax.f32 %v617_v47, 0.0  ;;  %v1322_v16 = vld [vmem:[%s1694_s2 + $0x38] sm:$0x30] }
 0x198   : > { %v1259_v17 = vor.u32 %v1322_v16, %v1258_v15 }
 0x199   : > { %v635_v59 = vmax.f32 %v588_v46, 0.0  ;;  %v657_v7 = vpack.c.bf16 %v636_v60, %v634_v5 }
 0x19b   : > { %v656_v3 = vpack.c.bf16 %v635_v59, %v633_v4 }
 0x19c   : > { %v619_v19 = vpop.f32.mrf.mxu3 }
 0x19d   : > { %v620_v42 = vadd.f32 %v619_v19, %v514_v26 }
 0x19e   : > { %v590_v18 = vpop.f32.mrf.mxu2 }
 0x19f   : > { %v591_v41 = vadd.f32 %v590_v18, %v514_v26  ;;  %v638_v56 = vmax.f32 %v620_v42, 0.0 }
 0x1a1   : > { %v637_v55 = vmax.f32 %v591_v41, 0.0 }
 0x1a4   : > { %v621_v21 = vpop.f32.mrf.mxu3 }
 0x1a5   : > { %v622_v36 = vadd.f32 %v621_v21, %v519_v32 }
 0x1a6   : > { %v592_v20 = vpop.f32.mrf.mxu2 }
 0x1a7   : > { %v593_v35 = vadd.f32 %v592_v20, %v519_v32  ;;  %v640_v49 = vmax.f32 %v622_v36, 0.0 }
 0x1a9   : > { %v639_v48 = vmax.f32 %v593_v35, 0.0  ;;  %v659_v62 = vpack.c.bf16 %v640_v49, %v638_v56 }
 0x1ab   : > { %v658_v61 = vpack.c.bf16 %v639_v48, %v637_v55 }
 0x1ac   : > { %v624_v25 = vpop.f32.mrf.mxu3 }
 0x1ad   : > { %v625_v29 = vadd.f32 %v624_v25, %v524_v23 }
 0x1ae   : > { %v595_v24 = vpop.f32.mrf.mxu2 }
 0x1af   : > { %v596_v28 = vadd.f32 %v595_v24, %v524_v23  ;;  %v642_v38 = vmax.f32 %v625_v29, 0.0 }
 0x1b1   : > { %v641_v37 = vmax.f32 %v596_v28, 0.0 }
 0x1b4   : > { %v626_v31 = vpop.f32.mrf.mxu3 }
 0x1b5   : > { %v627_v34 = vadd.f32 %v626_v31, %v529_v22  ;;  %v704_v31 = vpop.permute.xlu1 %703 }
 0x1b6   : > { %v597_v30 = vpop.f32.mrf.mxu2 }
 0x1b7   : > { %v598_v33 = vadd.f32 %v597_v30, %v529_v22  ;;  %v644_v40 = vmax.f32 %v627_v34, 0.0  ;;  %v709_v30 = vpop.permute.xlu2 %708  ;;  %v694_v34 = vpop.permute.xlu0 %693 }
 0x1b9   : > { %v643_v39 = vmax.f32 %v598_v33, 0.0  ;;  %v661_v45 = vpack.c.bf16 %v644_v40, %v642_v38 }
 0x1bb   : > { %v660_v44 = vpack.c.bf16 %v643_v39, %v641_v37  ;;  %v747_v51 = vsel %vm564_vm2, %v661_v45, 0 }
 0x1bc   : > { %782 = vmatpush.bf16.msrb.mxu1 %v747_v51 }
 0x1bd   : > { %v744_v50 = vsel %vm564_vm2, %v660_v44, 0  ;;  %v699_v40 = vpop.permute.xlu1 %698 }
 0x1be   : > { %753 = vmatpush.bf16.msrb.mxu0 %v744_v50 }
 0x1bf   : > { %v684_v35 = vpop.permute.xlu2 %683  ;;  %v689_v51 = vpop.permute.xlu0 %688 }
 0x1c0   : > { %783 = vmatpush.bf16.msrb.mxu1 %v659_v62 }
 0x1c2   : > { %754 = vmatpush.bf16.msrb.mxu0 %v658_v61 }
 0x1c4   : > { %784 = vmatpush.bf16.msrb.mxu1 %v657_v7 }
 0x1c5   : > { %v674_v7 = vpop.permute.xlu1 %673 }
 0x1c6   : > { %755 = vmatpush.bf16.msrb.mxu0 %v656_v3 }
 0x1c7   : > { %v679_v60 = vpop.permute.xlu2 %678 }
 0x1c8   : > { %785 = vmatpush.bf16.msrb.mxu1 %v655_v13 }
 0x1ca   : > { %756 = vmatpush.bf16.msrb.mxu0 %v654_v12 }
 0x1cb   : > { %1264 = vmatmul.msk.bf16.vlgmr.msrb.gmra.mxu1 %vm551_vm3, %v1319_v14 }
 0x1cd   : > { %1260 = vmatmul.msk.bf16.vlgmr.msrb.gmra.mxu0 %vm551_vm3, %v1319_v14 }
 0x1db   : > { %1265 = vmatmul.msk.bf16.gmra.mxu1 %vm551_vm3, %v1320_v10 }
 0x1dd   : > { %1261 = vmatmul.msk.bf16.gmra.mxu0 %vm551_vm3, %v1320_v10 }
 0x1eb   : > { %1266 = vmatmul.msk.bf16.gmra.mxu1 %vm551_vm3, %v1321_v11 }
 0x1ed   : > { %1262 = vmatmul.msk.bf16.gmra.mxu0 %vm551_vm3, %v1321_v11 }
 0x1fb   : > { %1267 = vmatmul.msk.bf16.gmra.mxu1 %vm551_vm3, %v1259_v17 }
 0x1fd   : > { %1263 = vmatmul.msk.bf16.gmra.mxu0 %vm551_vm3, %v1259_v17 }
 0x248   : > { %v787_v19 = vpop.f32.mrf.mxu1 }
 0x249   : > { %v788_v9 = vadd.f32 %v787_v19, %v674_v7  ;;  %v1325_v19 = vld [vmem:[%s1694_s2 + $0x50] sm:$0xff] }
 0x24a   : > { %v758_v18 = vpop.f32.mrf.mxu0 }
 0x24b   : > { %v759_v8 = vadd.f32 %v758_v18, %v674_v7  ;;  %v808_v17 = vmax.f32 %v788_v9, 0.0  ;;  %v1324_v18 = vld [vmem:[%s1694_s2 + $0x48] sm:$0xff] }
 0x24d   : > { %v807_v16 = vmax.f32 %v759_v8, 0.0 }
 0x250   : > { %v789_v21 = vpop.f32.mrf.mxu1 }
 0x251   : > { %v790_v4 = vadd.f32 %v789_v21, %v679_v60 }
 0x252   : > { %v760_v20 = vpop.f32.mrf.mxu0 }
 0x253   : > { %v761_v1 = vadd.f32 %v760_v20, %v679_v60  ;;  %v810_v10 = vmax.f32 %v790_v4, 0.0 }
 0x255   : > { %v809_v14 = vmax.f32 %v761_v1, 0.0  ;;  %v833_v21 = vpack.c.bf16 %v810_v10, %v808_v17 }
 0x257   : > { %v832_v20 = vpack.c.bf16 %v809_v14, %v807_v16 }
 0x258   : > { %v792_v23 = vpop.f32.mrf.mxu1 }
 0x259   : > { %v793_v62 = vadd.f32 %v792_v23, %v684_v35  ;;  %v1298_v23 = vld [vmem:[%s1694_s2 + $0x58] sm:$0xf] }
 0x25a   : > { %v763_v22 = vpop.f32.mrf.mxu0 }
 0x25b   : > { %v764_v61 = vadd.f32 %v763_v22, %v684_v35  ;;  %v812_v13 = vmax.f32 %v793_v62, 0.0  ;;  %v1323_v22 = vld [vmem:[%s1694_s2 + $0x40] sm:$0xff] }
 0x25d   : > { %v811_v12 = vmax.f32 %v764_v61, 0.0 }
 0x260   : > { %v794_v25 = vpop.f32.mrf.mxu1 }
 0x261   : > { %v795_v55 = vadd.f32 %v794_v25, %v689_v51 }
 0x262   : > { %v765_v24 = vpop.f32.mrf.mxu0 }
 0x263   : > { %v766_v54 = vadd.f32 %v765_v24, %v689_v51  ;;  %v814_v6 = vmax.f32 %v795_v55, 0.0  ;;  %v1326_v24 = vld [vmem:[%s1694_s2 + $0x58] sm:$0x30] }
 0x264   : > { %v1299_v25 = vor.u32 %v1326_v24, %v1298_v23 }
 0x265   : > { %v813_v5 = vmax.f32 %v766_v54, 0.0  ;;  %v835_v15 = vpack.c.bf16 %v814_v6, %v812_v13 }
 0x267   : > { %v834_v11 = vpack.c.bf16 %v813_v5, %v811_v12 }
 0x268   : > { %v797_v27 = vpop.f32.mrf.mxu1 }
 0x269   : > { %v798_v50 = vadd.f32 %v797_v27, %v694_v34 }
 0x26a   : > { %v768_v26 = vpop.f32.mrf.mxu0 }
 0x26b   : > { %v769_v49 = vadd.f32 %v768_v26, %v694_v34  ;;  %v816_v0 = vmax.f32 %v798_v50, 0.0  ;;  %v862_v34 = vpop.permute.xlu2 %861 }
 0x26d   : > { %v815_v63 = vmax.f32 %v769_v49, 0.0 }
 0x270   : > { %v799_v29 = vpop.f32.mrf.mxu1 }
 0x271   : > { %v800_v44 = vadd.f32 %v799_v29, %v699_v40 }
 0x272   : > { %v770_v28 = vpop.f32.mrf.mxu0 }
 0x273   : > { %v771_v43 = vadd.f32 %v770_v28, %v699_v40  ;;  %v818_v57 = vmax.f32 %v800_v44, 0.0 }
 0x275   : > { %v817_v56 = vmax.f32 %v771_v43, 0.0  ;;  %v837_v3 = vpack.c.bf16 %v818_v57, %v816_v0 }
 0x277   : > { %v836_v2 = vpack.c.bf16 %v817_v56, %v815_v63 }
 0x278   : > { %v802_v33 = vpop.f32.mrf.mxu1 }
 0x279   : > { %v803_v37 = vadd.f32 %v802_v33, %v704_v31 }
 0x27a   : > { %v773_v32 = vpop.f32.mrf.mxu0 }
 0x27b   : > { %v774_v36 = vadd.f32 %v773_v32, %v704_v31  ;;  %v820_v46 = vmax.f32 %v803_v37, 0.0  ;;  %v857_v31 = vpop.permute.xlu1 %856 }
 0x27d   : > { %v819_v45 = vmax.f32 %v774_v36, 0.0 }
 0x280   : > { %v804_v39 = vpop.f32.mrf.mxu1 }
 0x281   : > { %v805_v42 = vadd.f32 %v804_v39, %v709_v30  ;;  %v1017_v39 = vpop.permute.xlu2 %1016 }
 0x282   : > { %v775_v38 = vpop.f32.mrf.mxu0 }
 0x283   : > { %v776_v41 = vadd.f32 %v775_v38, %v709_v30  ;;  %v822_v48 = vmax.f32 %v805_v42, 0.0  ;;  %v852_v30 = vpop.permute.xlu0 %851  ;;  %v1012_v38 = vpop.permute.xlu1 %1011 }
 0x285   : > { %v821_v47 = vmax.f32 %v776_v41, 0.0  ;;  %v839_v53 = vpack.c.bf16 %v822_v48, %v820_v46 }
 0x287   : > { %v838_v52 = vpack.c.bf16 %v821_v47, %v819_v45  ;;  %v925_v59 = vsel %vm564_vm2, %v839_v53, 0 }
 0x288   : > { %960 = vmatpush.bf16.msrb.mxu3 %v925_v59 }
 0x289   : > { %v922_v58 = vsel %vm564_vm2, %v838_v52, 0  ;;  %v877_v44 = vpop.permute.xlu2 %876 }
 0x28a   : > { %931 = vmatpush.bf16.msrb.mxu2 %v922_v58 }
 0x28b   : > { %v867_v35 = vpop.permute.xlu0 %866  ;;  %v1022_v43 = vpop.permute.xlu1 %1021 }
 0x28c   : > { %961 = vmatpush.bf16.msrb.mxu3 %v837_v3 }
 0x28e   : > { %932 = vmatpush.bf16.msrb.mxu2 %v836_v2 }
 0x290   : > { %962 = vmatpush.bf16.msrb.mxu3 %v835_v15 }
 0x291   : > { %v1032_v1 = vpop.permute.xlu2 %1031 }
 0x292   : > { %933 = vmatpush.bf16.msrb.mxu2 %v834_v11 }
 0x293   : > { %v872_v40 = vpop.permute.xlu0 %871  ;;  %v882_v58 = vpop.permute.xlu1 %881 }
 0x294   : > { %963 = vmatpush.bf16.msrb.mxu3 %v833_v21 }
 0x296   : > { %934 = vmatpush.bf16.msrb.mxu2 %v832_v20 }
 0x297   : > { %1304 = vmatmul.msk.bf16.vlgmr.msrb.gmra.mxu3 %vm551_vm3, %v1323_v22 }
 0x299   : > { %1300 = vmatmul.msk.bf16.vlgmr.msrb.gmra.mxu2 %vm551_vm3, %v1323_v22 }
 0x29b   : > { %v1027_v45 = vpop.permute.xlu0 %1026 }
 0x2a3   : > { %v887_v11 = vpop.permute.xlu0 %886 }
 0x2a7   : > { %1305 = vmatmul.msk.bf16.gmra.mxu3 %vm551_vm3, %v1324_v18 }
 0x2a9   : > { %1301 = vmatmul.msk.bf16.gmra.mxu2 %vm551_vm3, %v1324_v18 }
 0x2b7   : > { %1306 = vmatmul.msk.bf16.gmra.mxu3 %vm551_vm3, %v1325_v19 }
 0x2b9   : > { %1302 = vmatmul.msk.bf16.gmra.mxu2 %vm551_vm3, %v1325_v19 }
 0x2c7   : > { %1307 = vmatmul.msk.bf16.gmra.mxu3 %vm551_vm3, %v1299_v25 }
 0x2c9   : > { %1303 = vmatmul.msk.bf16.gmra.mxu2 %vm551_vm3, %v1299_v25 }
 0x31a   : > { %v965_v27 = vpop.f32.mrf.mxu3 }
 0x31b   : > { %v966_v51 = vadd.f32 %v965_v27, %v852_v30 }
 0x31c   : > { %v936_v26 = vpop.f32.mrf.mxu2 }
 0x31d   : > { %v937_v50 = vadd.f32 %v936_v26, %v852_v30  ;;  %v986_v60 = vmax.f32 %v966_v51, 0.0 }
 0x31f   : > { %v985_v59 = vmax.f32 %v937_v50, 0.0  ;;  %v1050_v13 = vmul.f32 %v1012_v38, %v986_v60 }
 0x321   : > { %v1049_v12 = vmul.f32 %v1012_v38, %v985_v59  ;;  %v1042_v38 = vpop.permute.xlu2 %1041 }
 0x322   : > { %v967_v29 = vpop.f32.mrf.mxu3 }
 0x323   : > { %v968_v47 = vadd.f32 %v967_v29, %v857_v31 }
 0x324   : > { %v938_v28 = vpop.f32.mrf.mxu2 }
 0x325   : > { %v939_v46 = vadd.f32 %v938_v28, %v857_v31  ;;  %v988_v55 = vmax.f32 %v968_v47, 0.0  ;;  %v1037_v31 = vpop.permute.xlu1 %1036  ;;  %v1047_v47 = vpop.permute.xlu0 %1046 }
 0x327   : > { %v987_v54 = vmax.f32 %v939_v46, 0.0  ;;  %v1052_v5 = vmul.f32 %v1017_v39, %v988_v55 }
 0x329   : > { %v1051_v4 = vmul.f32 %v1017_v39, %v987_v54  ;;  %v1080_v22 = vadd.f32 %v1052_v5, %v1050_v13 }
 0x32a   : > { %v970_v33 = vpop.f32.mrf.mxu3 }
 0x32b   : > { %v971_v53 = vadd.f32 %v970_v33, %v862_v34  ;;  %v1065_v21 = vadd.f32 %v1051_v4, %v1049_v12 }
 0x32c   : > { %v941_v32 = vpop.f32.mrf.mxu2 }
 0x32d   : > { %v942_v52 = vadd.f32 %v941_v32, %v862_v34  ;;  %v990_v62 = vmax.f32 %v971_v53, 0.0 }
 0x32f   : > { %v989_v61 = vmax.f32 %v942_v52, 0.0  ;;  %v1054_v10 = vmul.f32 %v1022_v43, %v990_v62 }
 0x331   : > { %v1053_v14 = vmul.f32 %v1022_v43, %v989_v61  ;;  %v1081_v26 = vadd.f32 %v1080_v22, %v1054_v10 }
 0x332   : > { %v972_v37 = vpop.f32.mrf.mxu3 }
 0x333   : > { %v973_v57 = vadd.f32 %v972_v37, %v867_v35  ;;  %v1066_v25 = vadd.f32 %v1065_v21, %v1053_v14 }
 0x334   : > { %v943_v36 = vpop.f32.mrf.mxu2 }
 0x335   : > { %v944_v56 = vadd.f32 %v943_v36, %v867_v35  ;;  %v992_v2 = vmax.f32 %v973_v57, 0.0 }
 0x337   : > { %v991_v6 = vmax.f32 %v944_v56, 0.0  ;;  %v1056_v19 = vmul.f32 %v1027_v45, %v992_v2 }
 0x339   : > { %v1055_v18 = vmul.f32 %v1027_v45, %v991_v6  ;;  %v1082_v33 = vadd.f32 %v1081_v26, %v1056_v19  ;;  %v1095_v6 = vstv %s1094_s16 }
 0x33a   : > { %v975_v42 = vpop.f32.mrf.mxu3 }
 0x33b   : > { %v976_v0 = vadd.f32 %v975_v42, %v872_v40  ;;  %v1067_v32 = vadd.f32 %v1066_v25, %v1055_v18 }
 0x33c   : > { %v946_v41 = vpop.f32.mrf.mxu2 }
 0x33d   : > { %v947_v63 = vadd.f32 %v946_v41, %v872_v40  ;;  %v994_v16 = vmax.f32 %v976_v0, 0.0 }
 0x33f   : > { %v993_v15 = vmax.f32 %v947_v63, 0.0  ;;  %v1058_v28 = vmul.f32 %v1032_v1, %v994_v16 }
 0x341   : > { %v1057_v27 = vmul.f32 %v1032_v1, %v993_v15  ;;  %v1083_v42 = vadd.f32 %v1082_v33, %v1058_v28 }
 0x342   : > { %v977_v49 = vpop.f32.mrf.mxu3 }
 0x343   : > { %v978_v7 = vadd.f32 %v977_v49, %v877_v44  ;;  %v1068_v41 = vadd.f32 %v1067_v32, %v1057_v27 }
 0x344   : > { %v948_v48 = vpop.f32.mrf.mxu2 }
 0x345   : > { %v949_v3 = vadd.f32 %v948_v48, %v877_v44  ;;  %v996_v24 = vmax.f32 %v978_v7, 0.0  ;;  %v1103_v7 = vlaneseq }
 0x347   : > { %v995_v23 = vmax.f32 %v949_v3, 0.0  ;;  %v1060_v35 = vmul.f32 %v1037_v31, %v996_v24  ;;  %vm1105_vm5 = vcmp.lt.s32.totalorder %v1103_v7, 256 }
 0x349   : > { %v1059_v34 = vmul.f32 %v1037_v31, %v995_v23  ;;  %v1084_v49 = vadd.f32 %v1083_v42, %v1060_v35 }
 0x34a   : > { %v980_v9 = vpop.f32.mrf.mxu3 }
 0x34b   : > { %v981_v20 = vadd.f32 %v980_v9, %v882_v58  ;;  %v1069_v48 = vadd.f32 %v1068_v41, %v1059_v34 }
 0x34c   : > { %v951_v8 = vpop.f32.mrf.mxu2 }
 0x34d   : > { %v952_v17 = vadd.f32 %v951_v8, %v882_v58  ;;  %v998_v30 = vmax.f32 %v981_v20, 0.0 }
 0x34f   : > { %v997_v29 = vmax.f32 %v952_v17, 0.0  ;;  %v1062_v44 = vmul.f32 %v1042_v38, %v998_v30 }
 0x351   : > { %v1061_v43 = vmul.f32 %v1042_v38, %v997_v29  ;;  %v1085_v53 = vadd.f32 %v1084_v49, %v1062_v44 }
 0x352   : > { %v982_v37 = vpop.f32.mrf.mxu3 }
 0x353   : > { %v983_v40 = vadd.f32 %v982_v37, %v887_v11  ;;  %v1070_v52 = vadd.f32 %v1069_v48, %v1061_v43 }
 0x354   : > { %v953_v36 = vpop.f32.mrf.mxu2 }
 0x355   : > { %v954_v39 = vadd.f32 %v953_v36, %v887_v11  ;;  %v1000_v46 = vmax.f32 %v983_v40, 0.0 }
 0x357   : > { %v999_v45 = vmax.f32 %v954_v39, 0.0  ;;  %v1064_v51 = vmul.f32 %v1047_v47, %v1000_v46 }
 0x359   : > { %v1063_v50 = vmul.f32 %v1047_v47, %v999_v45  ;;  %v1086_v55 = vsel %vm1071_vm4, %v1064_v51, 0.0 }
 0x35a   : > { %v1087_v57 = vadd.f32 %v1086_v55, %v1085_v53 }
 0x35b   : > { %v1072_v54 = vsel %vm1071_vm4, %v1063_v50, 0.0 }
 0x35c   : > { %v1073_v56 = vadd.f32 %v1072_v54, %v1070_v52  ;;  %v1088_v59 = vrot.slane %v1087_v57, 4 }
 0x35e   : > { %v1074_v58 = vrot.slane %v1073_v56, 4  ;;  %v1089_v61 = vadd.f32 %v1088_v59, %v1087_v57 }
 0x360   : > { %v1075_v60 = vadd.f32 %v1074_v58, %v1073_v56  ;;  %v1090_v63 = vrot.slane %v1089_v61, 2 }
 0x362   : > { %v1076_v62 = vrot.slane %v1075_v60, 2  ;;  %v1091_v1 = vadd.f32 %v1090_v63, %v1089_v61 }
 0x364   : > { %v1077_v0 = vadd.f32 %v1076_v62, %v1075_v60  ;;  %v1092_v5 = vrot.slane %v1091_v1, 1 }
 0x366   : > { %v1078_v4 = vrot.slane %v1077_v0, 1  ;;  %v1093_v3 = vadd.f32 %v1092_v5, %v1091_v1 }
 0x368   : > { %v1079_v2 = vadd.f32 %v1078_v4, %v1077_v0  ;;  %v1097_v8 = vadd.f32 %v1095_v6, %v1093_v3 }
 0x36a   : > { %v1096_v9 = vadd.f32 %v1095_v6, %v1079_v2  ;;  %v1100_v12 = vrot.slane %v1097_v8, 7 }
 0x36c   : > { %v1101_v13 = vsel %vm383_vm0, %v1096_v9, %v1100_v12 }
 0x36d   : > { %1107 = vst.msk [vmem:[%s281_s20] sm:$0x3] %vm1105_vm5, %v1101_v13 }
 0x36e PF: > { %p14_p9 = scmp.ge.s32.totalorder %s1437_s26, 4   ;;  %s1699_s23 = smov %s1375_s24 }
 0x36f   : > { %s1700_s24 = smov %s1446_s29  ;;  %s1701_s25 = smov %s1437_s26 }
 0x370   :  { %16 = sbr.rel (!%p14_p9) target bundleno = 4 (0x4), region = 107 }

</bundles_post_ra>
